<compile_context>
chip_gen: v7x
topology: tpu7x:2x2x1
jax: 0.10.0
libtpu: 0.0.40
codegen_flags: <defaults>
</compile_context>

<pallas_src>
import math

import jax
import jax.numpy as jnp
import numpy as np
from jax.experimental import pallas as pl
from jax.experimental.pallas import tpu as pltpu


def _round_up(v, k):
    return (v + k - 1) // k * k


# ----------------------------------------------------------------------------
# Per-generation defaults (VMEM budget, tile-size hints, bf16 weight stream)
# ----------------------------------------------------------------------------
def _tpu_defaults():
    kind = ""
    try:
        kind = jax.devices()[0].device_kind.lower()
    except Exception:
        pass
    if "v5 lite" in kind or "v5e" in kind or "v5lite" in kind:
        # v5e: 128x128 MXU, lowest HBM BW -> bf16 weight stream matters most.
        return dict(vmem_budget=64 << 20, tm=128, tn=1024, bf16=True)
    if "v6" in kind:
        # v6e: 256x256 MXU, 128 MiB VMEM; default scoped limit is only 32 MiB.
        return dict(vmem_budget=96 << 20, tm=256, tn=2048, bf16=True)
    if "7" in kind:
        # v7x: only 64 MiB VMEM per TensorCore -> cap the budget at ~48 MiB.
        return dict(vmem_budget=48 << 20, tm=256, tn=2048, bf16=True)
    return dict(vmem_budget=64 << 20, tm=256, tn=1024, bf16=True)


def _choose_tiles(B, C, D, budget_bytes, *, x_bytes, w_bytes, out_bytes,
                  tm, tn, weight_buffers=2):
    """Pick (tm, tn) so the double-buffered tiles fit the VMEM budget."""
    tm = max(8, min(_round_up(tm, 8), _round_up(B, 8)))
    tn = max(128, min(_round_up(tn, 128), _round_up(C, 128)))
    nw = max(2, int(weight_buffers))
    cap = int(budget_bytes * 0.85)          # headroom for compiler scratch

    def vmem(tm_, tn_):
        return (2 * tm_ * D * x_bytes        # x block (double-buffered)
                + nw * tn_ * D * w_bytes     # streamed weight tiles
                + 2 * tm_ * tn_ * out_bytes  # output tiles
                + tm_ * D * w_bytes          # x_n scratch
                + 2 * tm_ * 8)               # labels (tiny)

    while tn > 128 and vmem(tm, tn) > cap:
        tn = _round_up(tn // 2, 128)
    while tm > 8 and vmem(tm, tn) > cap:
        tm = _round_up(tm // 2, 8)
    return tm, tn


# ----------------------------------------------------------------------------
# One-time weight preparation (amortize across forward calls / micro-steps)
# ----------------------------------------------------------------------------
def prepare_arc_weight(weight, *, tn, matmul_dtype=jnp.bfloat16):
    """Row-normalize the (C, D) weight, pad C to a multiple of tn, cast.

    The weight is a parameter: do this once per weight update, not inside
    every forward call.  Padded rows are exact zeros -> cosine 0, no NaNs,
    and they are sliced off by the wrapper anyway.
    """
    C, D = weight.shape
    w = weight.astype(jnp.float32)
    inv = jax.lax.rsqrt(
        jnp.maximum(jnp.sum(w * w, axis=1, keepdims=True), 1e-24))
    w_n = (w * inv).astype(matmul_dtype)
    Cp = _round_up(C, tn)
    if Cp != C:
        w_n = jnp.pad(w_n, ((0, Cp - C), (0, 0)))
    return w_n


# ----------------------------------------------------------------------------
# Kernel
# ----------------------------------------------------------------------------
def _make_arc_margin_kernel(s, cos_m, sin_m, th, mm, easy_margin, ls_eps,
                            out_features, tn):
    # Fold the scale s into the margin constants so the epilogue never does a
    # whole-tile `out * s` multiply.
    s = float(s)
    s_cos_m = s * cos_m
    s_sin_m = s * sin_m
    s_mm = s * mm

    def kernel(x_ref, w_ref, label_ref, out_ref, xn_ref):
        j = pl.program_id(1)

        # Hoist x normalization out of the class-tile loop: compute it once
        # per batch tile (j == 0) into a VMEM scratch and reuse for all j.
        @pl.when(j == 0)
        def _():
            x = x_ref[...].astype(jnp.float32)                     # (tm, D)
            inv = jax.lax.rsqrt(
                jnp.maximum(jnp.sum(x * x, axis=-1, keepdims=True), 1e-24))
            xn_ref[...] = (x * inv).astype(xn_ref.dtype)

        # cosine = x_n @ w_n^T ; weight tile is already normalized.  NT
        # contraction on the shared lane axis -> no in-kernel transpose.
        cosine = jax.lax.dot_general(
            xn_ref[...], w_ref[...],
            dimension_numbers=(((1,), (1,)), ((), ())),
            preferred_element_type=jnp.float32)                    # (tm, tn)

        # Clamp at 0 so |cos| > 1 by a ULP (bf16 path) can't produce NaN.
        sine = jnp.sqrt(jnp.maximum(1.0 - cosine * cosine, 0.0))
        phi_s = cosine * s_cos_m - sine * s_sin_m                  # s*phi
        cos_s = cosine * s                                         # s*cosine
        if easy_margin:
            phi_s = jnp.where(cosine > 0.0, phi_s, cos_s)
        else:
            phi_s = jnp.where(cosine > th, phi_s, cos_s - s_mm)

        labels = label_ref[...]                                    # (tm, 1)
        classes = jax.lax.broadcasted_iota(jnp.int32, cosine.shape, 1) + j * tn
        is_target = classes == labels                              # (tm, tn)

        if ls_eps > 0.0:
            on = (1.0 - ls_eps) + ls_eps / out_features
            off = ls_eps / out_features
            one_hot = jnp.where(is_target, on, off)
            out = cos_s + one_hot * (phi_s - cos_s)
        else:
            out = jnp.where(is_target, phi_s, cos_s)

        out_ref[...] = out.astype(out_ref.dtype)

    return kernel


# ----------------------------------------------------------------------------
# Forward (prepared-weight entry point)
# ----------------------------------------------------------------------------
def arc_margin_forward(x, w_prepared, label, *, out_features, s, m,
                       easy_margin, ls_eps, tm, tn,
                       out_dtype=jnp.float32, vmem_limit_bytes=None,
                       weight_buffers=2):
    """x: (B, D) f32, w_prepared: (Cp, D) normalized (+padded to tn, optionally
    bf16) from prepare_arc_weight, label: (B,) int.  Returns (B, out_features).
    """
    B, D = x.shape
    Cp, D2 = w_prepared.shape
    assert D == D2, "feature dims of input and prepared weight must match"
    assert Cp % tn == 0 and Cp >= out_features, "weight not prepared for this tn"

    cos_m = math.cos(m)
    sin_m = math.sin(m)
    th = math.cos(math.pi - m)
    mm = math.sin(math.pi - m) * m

    tm = max(8, min(_round_up(tm, 8), _round_up(B, 8)))
    Bp = _round_up(B, tm)
    grid_i = Bp // tm
    grid_j = Cp // tn

    x_p = x if Bp == B else jnp.pad(x, ((0, Bp - B), (0, 0)))
    lab = label.astype(jnp.int32)
    if Bp != B:
        lab = jnp.pad(lab, (0, Bp - B), constant_values=-1)
    label2d = lab.reshape(Bp, 1)

    kernel = _make_arc_margin_kernel(
        s, cos_m, sin_m, th, mm, easy_margin, ls_eps, out_features, tn)

    w_spec_kwargs = {}
    if weight_buffers and int(weight_buffers) > 2:
        # Deeper pipelining on the streamed weight if DMA is exposed.
        w_spec_kwargs["pipeline_mode"] = pl.Buffered(int(weight_buffers))
    w_spec = pl.BlockSpec((tn, D), lambda i, j: (j, 0), **w_spec_kwargs)

    out_bytes = jnp.dtype(out_dtype).itemsize
    cost = pl.CostEstimate(
        flops=2 * Bp * Cp * D + 12 * Bp * Cp,
        transcendentals=Bp * Cp + Bp,
        bytes_accessed=(Bp * D * x_p.dtype.itemsize
                        + grid_i * Cp * D * w_prepared.dtype.itemsize
                        + Bp * Cp * out_bytes
                        + Bp * 4),
    )

    cp_kwargs = dict(dimension_semantics=("parallel", "arbitrary"))
    if vmem_limit_bytes is not None:
        cp_kwargs["vmem_limit_bytes"] = int(vmem_limit_bytes)

    out = pl.pallas_call(
        kernel,
        out_shape=jax.ShapeDtypeStruct((Bp, Cp), out_dtype),
        grid=(grid_i, grid_j),
        in_specs=[
            pl.BlockSpec((tm, D), lambda i, j: (i, 0)),   # x: resident over j
            w_spec,                                       # weight: streamed
            pl.BlockSpec((tm, 1), lambda i, j: (i, 0)),   # labels (tiny)
        ],
        out_specs=pl.BlockSpec((tm, tn), lambda i, j: (i, j)),
        scratch_shapes=[pltpu.VMEM((tm, D), w_prepared.dtype)],  # x_n scratch
        compiler_params=pltpu.CompilerParams(**cp_kwargs),
        cost_estimate=cost,
    )(x_p, w_prepared, label2d)

    return out[:B, :out_features]


# ----------------------------------------------------------------------------
# Convenience one-shot wrapper (chooses tiles, prepares weight, runs forward)
# ----------------------------------------------------------------------------
def arc_margin_product(x, weight, label, *, s, m, easy_margin, ls_eps,
                       matmul_dtype=None, tm=None, tn=None,
                       out_dtype=jnp.float32, weight_buffers=2):
    B, D = x.shape
    C, _ = weight.shape
    cfg = _tpu_defaults()
    if matmul_dtype is None:
        matmul_dtype = jnp.bfloat16 if cfg["bf16"] else jnp.float32
    tm_, tn_ = _choose_tiles(
        B, C, D, cfg["vmem_budget"],
        x_bytes=x.dtype.itemsize,
        w_bytes=jnp.dtype(matmul_dtype).itemsize,
        out_bytes=jnp.dtype(out_dtype).itemsize,
        tm=tm if tm is not None else cfg["tm"],
        tn=tn if tn is not None else cfg["tn"],
        weight_buffers=weight_buffers)
    # For training loops: hoist this call out and reuse until the weight updates.
    w_prep = prepare_arc_weight(weight, tn=tn_, matmul_dtype=matmul_dtype)
    return arc_margin_forward(
        x, w_prep, label, out_features=C, s=s, m=m,
        easy_margin=easy_margin, ls_eps=ls_eps, tm=tm_, tn=tn_,
        out_dtype=out_dtype, vmem_limit_bytes=cfg["vmem_budget"],
        weight_buffers=weight_buffers)


# ----------------------------------------------------------------------------
# Reference + init helpers
# ----------------------------------------------------------------------------
def _xavier_uniform(key, out_features, in_features):
    bound = math.sqrt(6.0 / (in_features + out_features))
    return jax.random.uniform(
        key, (out_features, in_features), dtype=jnp.float32,
        minval=-bound, maxval=bound)


def _arc_margin_reference(x, weight, label, *, s, m, easy_margin, ls_eps):
    """Pure-JAX f32 reference matching the PyTorch module."""
    xf = x.astype(jnp.float32)
    wf = weight.astype(jnp.float32)
    x_n = xf / jnp.maximum(jnp.linalg.norm(xf, axis=1, keepdims=True), 1e-12)
    w_n = wf / jnp.maximum(jnp.linalg.norm(wf, axis=1, keepdims=True), 1e-12)
    cosine = x_n @ w_n.T
    sine = jnp.sqrt(jnp.maximum(1.0 - cosine * cosine, 0.0))
    cos_m, sin_m = math.cos(m), math.sin(m)
    th = math.cos(math.pi - m)
    mm = math.sin(math.pi - m) * m
    phi = cosine * cos_m - sine * sin_m
    if easy_margin:
        phi = jnp.where(cosine > 0.0, phi, cosine)
    else:
        phi = jnp.where(cosine > th, phi, cosine - mm)
    one_hot = jax.nn.one_hot(label, weight.shape[0], dtype=jnp.float32)
    if ls_eps > 0:
        one_hot = (1.0 - ls_eps) * one_hot + ls_eps / weight.shape[0]
    return s * (one_hot * phi + (1.0 - one_hot) * cosine)


if __name__ == "__main__":
    in_features = 32
    out_features = 512
    batch = 8
    s = 30.0
    m = 0.50

    key = jax.random.PRNGKey(0)
    k_w, k_x, k_l = jax.random.split(key, 3)
    weight = _xavier_uniform(k_w, out_features, in_features)
    x = jax.random.normal(k_x, (batch, in_features), dtype=jnp.float32)
    label = jax.random.randint(k_l, (batch,), 0, out_features, dtype=jnp.int32)

    # 1) Default fast path: bf16 weight stream, auto per-generation tiling.
    out = arc_margin_product(x, weight, label, s=s, m=m,
                             easy_margin=False, ls_eps=0.0)
    out = jax.block_until_ready(out)
    assert out.shape == (batch, out_features)
    ref = _arc_margin_reference(x, weight, label, s=s, m=m,
                                easy_margin=False, ls_eps=0.0)
    np.testing.assert_allclose(np.asarray(out), np.asarray(ref),
                               atol=0.5, rtol=0.02)   # bf16 cosine tolerance

    # 2) f32 matmul, small tn to exercise the class-tiled grid, with the
    #    prepared weight reused across calls (amortized prep).
    tn = 128
    w_prep = prepare_arc_weight(weight, tn=tn, matmul_dtype=jnp.float32)
    for ls_eps in (0.0, 0.1):
        out = arc_margin_forward(x, w_prep, label, out_features=out_features,
                                 s=s, m=m, easy_margin=False, ls_eps=ls_eps,
                                 tm=128, tn=tn)
        out = jax.block_until_ready(out)
        assert out.shape == (batch, out_features) and out.dtype == jnp.float32
        ref = _arc_margin_reference(x, weight, label, s=s, m=m,
                                    easy_margin=False, ls_eps=ls_eps)
        np.testing.assert_allclose(np.asarray(out), np.asarray(ref),
                                   atol=1e-3, rtol=1e-3)

    # 3) easy_margin path (f32).  Elements with cosine ~ 0 may legitimately
    #    flip across the `cosine > 0` select due to f32 summation-order noise,
    #    so compare only where |cosine| is comfortably away from the threshold.
    out = arc_margin_forward(x, w_prep, label, out_features=out_features,
                             s=s, m=m, easy_margin=True, ls_eps=0.0,
                             tm=128, tn=tn)
    out = jax.block_until_ready(out)
    ref = _arc_margin_reference(x, weight, label, s=s, m=m,
                                easy_margin=True, ls_eps=0.0)
    xn = x / jnp.linalg.norm(x, axis=1, keepdims=True)
    wn = weight / jnp.linalg.norm(weight, axis=1, keepdims=True)
    safe = np.abs(np.asarray(xn @ wn.T)) > 1e-4
    np.testing.assert_allclose(np.asarray(out)[safe], np.asarray(ref)[safe],
                               atol=1e-3, rtol=1e-3)

    print("KERNEL_OK")
</pallas_src>

<mosaic_0001>
module attributes {stable_mosaic.version = 11 : i64} {
  func.func @kernel(%arg0: i32, %arg1: i32, %arg2: memref<8x32xf32, #tpu.memory_space<vmem>>, %arg3: memref<512x32xbf16, #tpu.memory_space<vmem>>, %arg4: memref<8x1xi32, #tpu.memory_space<vmem>>, %arg5: memref<8x512xf32, #tpu.memory_space<vmem>>, %arg6: memref<8x32xbf16, #tpu.memory_space<vmem>>) attributes {dimension_semantics = [#tpu.dimension_semantics<parallel>, #tpu.dimension_semantics<arbitrary>], iteration_bounds = array<i64: 1, 1>, scalar_prefetch = 0 : i64, scratch_operands = 1 : i64, tpu.core_type = #tpu.core_type<tc>, window_params = [{transform_indices = @transform_0, window_bounds = array<i64: 8, 32>}, {transform_indices = @transform_1, window_bounds = array<i64: 512, 32>}, {transform_indices = @transform_2, window_bounds = array<i64: 8, 1>}, {transform_indices = @transform_3, window_bounds = array<i64: 8, 512>}]} {
    %c0_i32 = arith.constant 0 : i32
    %0 = arith.cmpi eq, %arg1, %c0_i32 : i32
    %1 = arith.extui %0 : i1 to i32
    %c0_i32_0 = arith.constant 0 : i32
    %2 = arith.cmpi ne, %1, %c0_i32_0 : i32
    scf.if %2 {
      %c0_15 = arith.constant 0 : index
      %c0_16 = arith.constant 0 : index
      %33 = vector.load %arg2[%c0_15, %c0_16] : memref<8x32xf32, #tpu.memory_space<vmem>>, vector<8x32xf32>
      %34 = arith.mulf %33, %33 : vector<8x32xf32>
      %cst_17 = arith.constant dense<0.000000e+00> : vector<8xf32>
      %35 = vector.multi_reduction <add>, %34, %cst_17 [1] : vector<8x32xf32> to vector<8xf32>
      %36 = vector.shape_cast %35 : vector<8xf32> to vector<8x1xf32>
      %cst_18 = arith.constant 1.000000e-24 : f32
      %37 = vector.broadcast %cst_18 : f32 to vector<8x1xf32>
      %38 = arith.maximumf %36, %37 : vector<8x1xf32>
      %39 = math.rsqrt %38 : vector<8x1xf32>
      %40 = vector.broadcast %39 : vector<8x1xf32> to vector<8x32xf32>
      %41 = arith.mulf %33, %40 : vector<8x32xf32>
      %42 = arith.truncf %41 : vector<8x32xf32> to vector<8x32xbf16>
      %c0_19 = arith.constant 0 : index
      %c0_20 = arith.constant 0 : index
      %43 = vector.load %arg6[%c0_19, %c0_20] : memref<8x32xbf16, #tpu.memory_space<vmem>>, vector<8x32xbf16>
      tpu.vector_store %arg6[%c0_19, %c0_20], %42 {strides = array<i32>} : memref<8x32xbf16, #tpu.memory_space<vmem>>, vector<8x32xbf16>,
    } else {
    }
    %c0 = arith.constant 0 : index
    %c0_1 = arith.constant 0 : index
    %3 = vector.load %arg6[%c0, %c0_1] : memref<8x32xbf16, #tpu.memory_space<vmem>>, vector<8x32xbf16>
    %c0_2 = arith.constant 0 : index
    %c0_3 = arith.constant 0 : index
    %4 = vector.load %arg3[%c0_2, %c0_3] : memref<512x32xbf16, #tpu.memory_space<vmem>>, vector<512x32xbf16>
    %cst = arith.constant dense<0.000000e+00> : vector<8x512xf32>
    %5 = tpu.matmul %3, %4, %cst {dimension_numbers = #tpu.dot_dimension_numbers<[1], [1], [0], [0], [0, 0, 1, 0], [], []>} : vector<8x32xbf16>, vector<512x32xbf16>, vector<8x512xf32> -> vector<8x512xf32>
    %6 = arith.mulf %5, %5 : vector<8x512xf32>
    %cst_4 = arith.constant 1.000000e+00 : f32
    %7 = vector.broadcast %cst_4 : f32 to vector<8x512xf32>
    %8 = arith.subf %7, %6 : vector<8x512xf32>
    %cst_5 = arith.constant 0.000000e+00 : f32
    %9 = vector.broadcast %cst_5 : f32 to vector<8x512xf32>
    %10 = arith.maximumf %8, %9 : vector<8x512xf32>
    %11 = math.sqrt %10 : vector<8x512xf32>
    %cst_6 = arith.constant 26.3274765 : f32
    %12 = vector.broadcast %cst_6 : f32 to vector<8x512xf32>
    %13 = arith.mulf %5, %12 : vector<8x512xf32>
    %cst_7 = arith.constant 14.3827658 : f32
    %14 = vector.broadcast %cst_7 : f32 to vector<8x512xf32>
    %15 = arith.mulf %11, %14 : vector<8x512xf32>
    %16 = arith.subf %13, %15 : vector<8x512xf32>
    %cst_8 = arith.constant 3.000000e+01 : f32
    %17 = vector.broadcast %cst_8 : f32 to vector<8x512xf32>
    %18 = arith.mulf %5, %17 : vector<8x512xf32>
    %cst_9 = arith.constant -0.87758255 : f32
    %19 = vector.broadcast %cst_9 : f32 to vector<8x512xf32>
    %20 = arith.cmpf ogt, %5, %19 : vector<8x512xf32>
    %cst_10 = arith.constant 7.19138288 : f32
    %21 = vector.broadcast %cst_10 : f32 to vector<8x512xf32>
    %22 = arith.subf %18, %21 : vector<8x512xf32>
    %23 = arith.select %20, %16, %22 : vector<8x512xi1>, vector<8x512xf32>
    %c0_11 = arith.constant 0 : index
    %c0_12 = arith.constant 0 : index
    %24 = vector.load %arg4[%c0_11, %c0_12] : memref<8x1xi32, #tpu.memory_space<vmem>>, vector<8x1xi32>
    %25 = tpu.iota {dimensions = array<i32: 1>} : vector<8x512xi32>
    %c512_i32 = arith.constant 512 : i32
    %26 = arith.muli %arg1, %c512_i32 : i32
    %27 = vector.broadcast %26 : i32 to vector<8x512xi32>
    %28 = arith.addi %25, %27 : vector<8x512xi32>
    %29 = vector.broadcast %24 : vector<8x1xi32> to vector<8x512xi32>
    %30 = arith.cmpi eq, %28, %29 : vector<8x512xi32>
    %31 = arith.select %30, %23, %18 : vector<8x512xi1>, vector<8x512xf32>
    %c0_13 = arith.constant 0 : index
    %c0_14 = arith.constant 0 : index
    %32 = vector.load %arg5[%c0_13, %c0_14] : memref<8x512xf32, #tpu.memory_space<vmem>>, vector<8x512xf32>
    tpu.vector_store %arg5[%c0_13, %c0_14], %31 {strides = array<i32>} : memref<8x512xf32, #tpu.memory_space<vmem>>, vector<8x512xf32>,
    return
  }
  func.func @transform_0(%arg0: i32, %arg1: i32) -> (i32, i32) {
    %c0_i32 = arith.constant 0 : i32
    %c0_i32_0 = arith.constant 0 : i32
    return %arg0, %c0_i32 : i32, i32
  }
  func.func @transform_1(%arg0: i32, %arg1: i32) -> (i32, i32) {
    %c0_i32 = arith.constant 0 : i32
    %c0_i32_0 = arith.constant 0 : i32
    return %arg1, %c0_i32 : i32, i32
  }
  func.func @transform_2(%arg0: i32, %arg1: i32) -> (i32, i32) {
    %c0_i32 = arith.constant 0 : i32
    %c0_i32_0 = arith.constant 0 : i32
    return %arg0, %c0_i32 : i32, i32
  }
  func.func @transform_3(%arg0: i32, %arg1: i32) -> (i32, i32) {
    %c0_i32 = arith.constant 0 : i32
    return %arg0, %arg1 : i32, i32
  }
}

</mosaic_0001>

<bundles_post_ra>
// kernel: tpu_custom_call.1
= control target key start
LH: loop header
LB: loop body
LE: loop exit
PB: predicated region body
PF: predicated region fallthrough
CT: control target
= control target key end

     0   :  { %8 = vsyncpa [#allocation4], 0  ;;  %s989_s0 = inlined_call_operand.hbm [shape: f32[8,32], index: 0, kind: input, shape index: {}]   ;;  %s990_s1 = inlined_call_operand.hbm [shape: bf16[512,32], index: 1, kind: input, shape index: {}]   ;;  %s991_s2 = inlined_call_operand.hbm [shape: s32[8,1], index: 2, kind: input, shape index: {}]   ;;  %s992_s3 = inlined_call_operand.hbm [shape: f32[8,512], index: 3, kind: output, shape index: {}]  }
   0x1   :  { %9 = vsyncpa [#allocation7], 0 }
   0x2   :  { %10 = vsyncpa [#allocation5], 0  ;;  %s821_s12 = smov [#allocation6]   ;;  %s727_s16 = scalar_lea.hbm %s990_s1, 4096 }
   0x3   :  { %s26_s13 = sshll.u32 %s821_s12, 4  ;;  %p728_p0 = scmp.ne.s32.totalorder %s990_s1, %s727_s16  ;;  %s27_s13 = int_to_ptr.vmem [resolvable:$true] %s26_s13 }
   0x4   :  { %p731_p1 = scmp.lt.u32.totalorder %s727_s16, %s990_s1 }
   0x6   :  { %p733_p2 = pnand %p731_p1, %p728_p0 }
   0x8   :  { %736 = shalt.err (!%p733_p2)
}
   0x9   :  { %s737_s21 = scalar_lea.vmem %s27_s13, 4096  ;;  %p742_p4 = scmp.lt.s32.totalorder %s27_s13, %s27_s13 }
   0xa   :  { %p738_p3 = scmp.ne.s32.totalorder %s27_s13, %s737_s21  ;;  %p743_p5 = scmp.lt.s32.totalorder %s737_s21, %s737_s21 }
   0xc   :  { %p744_p6 = por %p743_p5, %p742_p4 }
   0xe   :  { %p745_p7 = pnand %p744_p6, %p738_p3 }
  0x10   :  { %748 = shalt.err (!%p745_p7)
}
  0x11   :  { %s822_s22 = smov 64   ;;  %s823_s23 = smov 4  }
  0x12   :  { %32 = dma.hbm_to_vmem [thread:$0]  %s990_s1, 4096, %s27_s13, [#allocation7], %s822_s22, %s822_s22, %s823_s23  }
  0x13   :  { %s824_s26 = smov [#allocation3]   ;;  %s825_s28 = smov [#allocation8]  }
  0x14   :  { %s17_s27 = sshll.u32 %s824_s26, 4  ;;  %s39_s29 = sshll.u32 %s825_s28, 4  ;;  %s18_s27 = int_to_ptr.vmem [resolvable:$true] %s17_s27  ;;  %s40_s29 = int_to_ptr.vmem [resolvable:$true] %s39_s29 }
  0x15   :  { %s749_s5 = scalar_lea.hbm %s989_s0, 128 }
  0x16   :  { %p750_p8 = scmp.ne.s32.totalorder %s989_s0, %s749_s5  ;;  %p753_p9 = scmp.lt.u32.totalorder %s749_s5, %s989_s0 }
  0x18   :  { %p755_p10 = pnand %p753_p9, %p750_p8 }
  0x1a   :  { %758 = shalt.err (!%p755_p10)
}
  0x1b   :  { %s759_s1 = scalar_lea.vmem %s18_s27, 128  ;;  %p764_p12 = scmp.lt.s32.totalorder %s18_s27, %s18_s27 }
  0x1c   :  { %p760_p11 = scmp.ne.s32.totalorder %s18_s27, %s759_s1  ;;  %p765_p13 = scmp.lt.s32.totalorder %s759_s1, %s759_s1 }
  0x1e   :  { %p766_p0 = por %p765_p13, %p764_p12 }
  0x20   :  { %p767_p1 = pnand %p766_p0, %p760_p11 }
  0x22   :  { %770 = shalt.err (!%p767_p1)
}
  0x23   :  { %20 = dma.hbm_to_vmem [thread:$0]  %s989_s0, 128, %s18_s27, [#allocation4]  }
  0x24   :  { %s771_s14 = scalar_lea.hbm %s991_s2, 128 }
  0x25   :  { %p772_p2 = scmp.ne.s32.totalorder %s991_s2, %s771_s14  ;;  %p775_p3 = scmp.lt.u32.totalorder %s771_s14, %s991_s2 }
  0x27   :  { %p777_p4 = pnand %p775_p3, %p772_p2 }
  0x29   :  { %780 = shalt.err (!%p777_p4)
}
  0x2a   :  { %s781_s19 = scalar_lea.vmem %s40_s29, 128  ;;  %p786_p6 = scmp.lt.s32.totalorder %s40_s29, %s40_s29 }
  0x2b   :  { %p782_p5 = scmp.ne.s32.totalorder %s40_s29, %s781_s19  ;;  %p787_p7 = scmp.lt.s32.totalorder %s781_s19, %s781_s19 }
  0x2d   :  { %p788_p8 = por %p787_p7, %p786_p6 }
  0x2f   :  { %p789_p9 = pnand %p788_p8, %p782_p5 }
  0x31   :  { %792 = shalt.err (!%p789_p9)
}
  0x32   :  { %42 = dma.hbm_to_vmem [thread:$0]  %s991_s2, 128, %s40_s29, [#allocation7]  }
  0x33   :  { %815 = dma.done.wait [#allocation4], 128  }
  0x34   :  { %816 = vsyncadd [#allocation4], 4294967168 }
  0x35   :  { %817 = dma.done.wait [#allocation7], 4224  }
  0x36   :  { %818 = vsyncadd [#allocation7], 4294963072  ;;  %v884_v0 = vld [vmem:[#allocation3] sm:$0xff]  ;;  %vm59_vm0 = vcmask 261120   ;;  %v685_v2 = vld [vmem:[#allocation6 + $0x40] sm:$0xff]   ;;  %v826_v42 = vmov 0  }
  0x37   :  { %v58_v1 = vmul.f32 %v884_v0, %v884_v0  ;;  %v686_v3 = vld [vmem:[#allocation6 + $0xc0] sm:$0xff]   ;;  %661 = vmatprep.subr.msk.bf16.mxu0 %vm59_vm0, %v685_v2  ;;  %v689_v8 = vld [vmem:[#allocation6 + $0x48] sm:$0xff]   ;;  %v693_v14 = vld [vmem:[#allocation6 + $0x50] sm:$0xff]   ;;  %684 = vset.pattern.permute.xlu0 %v826_v42  ;;  %vm67_vm1 = vcmask 257024   ;;  %s827_s2 = smov [#allocation9]  }
  0x38   :  { %v687_v5 = vld [vmem:[#allocation6] sm:$0xff]   ;;  %669 = vmatprep.subr.msk.bf16.mxu1 %vm59_vm0, %v686_v3  ;;  %v690_v10 = vld [vmem:[#allocation6 + $0xc8] sm:$0xff]   ;;  %v694_v16 = vld [vmem:[#allocation6 + $0xd0] sm:$0xff]   ;;  %s577_s21 = sshll.u32 %s827_s2, 4  ;;  %s578_s21 = int_to_ptr.vmem [resolvable:$true] %s577_s21 }
  0x39   :  { %v60_v4 = vsel %vm59_vm0, %v58_v1, 0.0  ;;  %v688_v6 = vld [vmem:[#allocation6 + $0x80] sm:$0xff]   ;;  %v299_v7 = vsel %vm59_vm0, %v687_v5, 0  ;;  %v691_v11 = vld [vmem:[#allocation6 + $0x8] sm:$0xff]   ;;  %v695_v17 = vld [vmem:[#allocation6 + $0x10] sm:$0xff]   ;;  %s793_s22 = scalar_lea.vmem %s578_s21, 512  ;;  %p798_p11 = scmp.lt.s32.totalorder %s578_s21, %s578_s21 }
  0x3a   :  { %61 = vadd.xlane.f32.xlu0 %v60_v4  ;;  %626 = vmatpush3.bf16.xpose.msra.mxu0 %v299_v7  ;;  %v347_v9 = vsel %vm59_vm0, %v688_v6, 0  ;;  %v692_v12 = vld [vmem:[#allocation6 + $0x88] sm:$0xff]   ;;  %v302_v13 = vsel %vm59_vm0, %v691_v11, 0  ;;  %v696_v18 = vld [vmem:[#allocation6 + $0x90] sm:$0xff]   ;;  %v305_v19 = vsel %vm59_vm0, %v695_v17, 0  ;;  %v697_v20 = vld [vmem:[#allocation6 + $0x58] sm:$0xff]   ;;  %p794_p10 = scmp.ne.s32.totalorder %s578_s21, %s793_s22  ;;  %p799_p12 = scmp.lt.s32.totalorder %s793_s22, %s793_s22 }
  0x3b   :  { %644 = vmatpush3.bf16.xpose.msra.mxu1 %v347_v9  ;;  %662 = vmatprep.subr.msk.bf16.mxu0 %vm59_vm0, %v689_v8  ;;  %v350_v15 = vsel %vm59_vm0, %v692_v12, 0  ;;  %v353_v21 = vsel %vm59_vm0, %v696_v18, 0  ;;  %v698_v22 = vld [vmem:[#allocation6 + $0xd8] sm:$0xff]   ;;  %v701_v26 = vld [vmem:[#allocation6 + $0x60] sm:$0xff]   ;;  %v705_v32 = vld [vmem:[#allocation6 + $0x68] sm:$0xff]  }
  0x3c   :  { %670 = vmatprep.subr.msk.bf16.mxu1 %vm59_vm0, %v690_v10  ;;  %v699_v23 = vld [vmem:[#allocation6 + $0x18] sm:$0xff]   ;;  %v702_v28 = vld [vmem:[#allocation6 + $0xe0] sm:$0xff]   ;;  %v706_v34 = vld [vmem:[#allocation6 + $0xe8] sm:$0xff]   ;;  %v545_v10 = vlaneseq  ;;  %p800_p13 = por %p799_p12, %p798_p11 }
  0x3d   :  { %v700_v24 = vld [vmem:[#allocation6 + $0x98] sm:$0xff]   ;;  %v308_v25 = vsel %vm59_vm0, %v699_v23, 0  ;;  %v703_v29 = vld [vmem:[#allocation6 + $0x20] sm:$0xff]   ;;  %v707_v35 = vld [vmem:[#allocation6 + $0x28] sm:$0xff]  }
  0x3e   :  { %v356_v27 = vsel %vm59_vm0, %v700_v24, 0  ;;  %v704_v30 = vld [vmem:[#allocation6 + $0xa0] sm:$0xff]   ;;  %v311_v31 = vsel %vm59_vm0, %v703_v29, 0  ;;  %v708_v36 = vld [vmem:[#allocation6 + $0xa8] sm:$0xff]   ;;  %v314_v37 = vsel %vm59_vm0, %v707_v35, 0  ;;  %v709_v38 = vld [vmem:[#allocation6 + $0x70] sm:$0xff]   ;;  %p801_p0 = pnand %p800_p13, %p794_p10 }
  0x3f   :  { %v359_v33 = vsel %vm59_vm0, %v704_v30, 0  ;;  %v362_v39 = vsel %vm59_vm0, %v708_v36, 0  ;;  %v710_v40 = vld [vmem:[#allocation6 + $0xf0] sm:$0xff]   ;;  %v544_v41 = vld [vmem:[#allocation8] sm:$0xff]  ;;  %v713_v46 = vld [vmem:[#allocation6 + $0x78] sm:$0xff]  }
  0x40   :  { %v711_v43 = vld [vmem:[#allocation6 + $0x30] sm:$0xff]   ;;  %v714_v48 = vld [vmem:[#allocation6 + $0xf8] sm:$0xff]  }
  0x41   :  { %v712_v44 = vld [vmem:[#allocation6 + $0xb0] sm:$0xff]   ;;  %v317_v45 = vsel %vm59_vm0, %v711_v43, 0  ;;  %v715_v49 = vld [vmem:[#allocation6 + $0x38] sm:$0xff]  }
  0x42   :  { %628 = vmatpush3.bf16.xpose.msra.mxu0 %v302_v13  ;;  %v365_v47 = vsel %vm59_vm0, %v712_v44, 0  ;;  %v716_v50 = vld [vmem:[#allocation6 + $0xb8] sm:$0xff]   ;;  %v320_v51 = vsel %vm59_vm0, %v715_v49, 0 }
  0x43   :  { %646 = vmatpush3.bf16.xpose.msra.mxu1 %v350_v15  ;;  %663 = vmatprep.subr.msk.bf16.mxu0 %vm59_vm0, %v693_v14  ;;  %v368_v52 = vsel %vm59_vm0, %v716_v50, 0  ;;  %v546_v15 = vand.u32 127, %v545_v10 }
  0x44   :  { %671 = vmatprep.subr.msk.bf16.mxu1 %vm59_vm0, %v694_v16 }
  0x45   :  { %v548_v17 = vadd.s32 256, %v546_v15 }
  0x4a   :  { %630 = vmatpush3.bf16.xpose.msra.mxu0 %v305_v19  ;;  %v944_v19 = vadd.s32 128, %v546_v15 }
  0x4b   :  { %648 = vmatpush3.bf16.xpose.msra.mxu1 %v353_v21  ;;  %664 = vmatprep.subr.msk.bf16.mxu0 %vm59_vm0, %v697_v20  ;;  %v946_v20 = vadd.s32 384, %v546_v15 }
  0x4c   :  { %672 = vmatprep.subr.msk.bf16.mxu1 %vm59_vm0, %v698_v22 }
  0x50   :  { %557 = vperm.xlu0 %684, %v544_v41  }
  0x52   :  { %632 = vmatpush3.bf16.xpose.msra.mxu0 %v308_v25 }
  0x53   :  { %650 = vmatpush3.bf16.xpose.msra.mxu1 %v356_v27  ;;  %665 = vmatprep.subr.msk.bf16.mxu0 %vm59_vm0, %v701_v26 }
  0x54   :  { %673 = vmatprep.subr.msk.bf16.mxu1 %vm59_vm0, %v702_v28 }
  0x5a   :  { %634 = vmatpush3.bf16.xpose.msra.mxu0 %v311_v31 }
  0x5b   :  { %652 = vmatpush3.bf16.xpose.msra.mxu1 %v359_v33  ;;  %666 = vmatprep.subr.msk.bf16.mxu0 %vm59_vm0, %v705_v32 }
  0x5c   :  { %674 = vmatprep.subr.msk.bf16.mxu1 %vm59_vm0, %v706_v34 }
  0x62   :  { %636 = vmatpush3.bf16.xpose.msra.mxu0 %v314_v37 }
  0x63   :  { %654 = vmatpush3.bf16.xpose.msra.mxu1 %v362_v39  ;;  %667 = vmatprep.subr.msk.bf16.mxu0 %vm59_vm0, %v709_v38 }
  0x64   :  { %675 = vmatprep.subr.msk.bf16.mxu1 %vm59_vm0, %v710_v40 }
  0x6a   :  { %638 = vmatpush3.bf16.xpose.msra.mxu0 %v317_v45 }
  0x6b   :  { %656 = vmatpush3.bf16.xpose.msra.mxu1 %v365_v47  ;;  %668 = vmatprep.subr.msk.bf16.mxu0 %vm59_vm0, %v713_v46 }
  0x6c   :  { %676 = vmatprep.subr.msk.bf16.mxu1 %vm59_vm0, %v714_v48 }
  0x72   :  { %640 = vmatpush3.bf16.xpose.msra.mxu0 %v320_v51 }
  0x73   :  { %658 = vmatpush3.bf16.xpose.msra.mxu1 %v368_v52 }
  0xc7   :  { %v62_v53 = vpop.xlane.xlu0 %61 }
  0xc8   :  { %v63_v54 = vmax.f32 %v62_v53, 1e-24 }
  0xca   :  { %717 = vrsqrt.f32 %v63_v54 }
  0xcf   :  { %v942_v18 = vpop.permute.xlu0 %557 }
  0xd0   :  { %vm559_vm2 = vcmp.eq.s32.totalorder %v546_v15, %v942_v18  ;;  %vm561_vm3 = vcmp.eq.s32.totalorder %v548_v17, %v942_v18  ;;  %vm560_vm9 = vcmp.eq.s32.totalorder %v944_v19, %v942_v18 }
  0xd4   :  { %v718_v55 = vpop.eup %717 }
  0xd5   :  { %v65_v56 = vmul.f32 %v718_v55, %v884_v0 }
  0xd7   :  { %v66_v57 = vpack.c.bf16 %v65_v56, %v65_v56 }
  0xd9   :  { %68 = vst.msk [vmem:[#allocation2] sm:$0xf] %vm67_vm1, %v66_v57 }
  0xe0   :  { %v69_v58 = vld [vmem:[#allocation2] sm:$0xf] }
  0xe1   :  { %641 = vmatprep.mubr.msk.bf16.mxu0 %vm59_vm0, %v69_v58  ;;  %659 = vmatprep.mubr.msk.bf16.mxu1 %vm59_vm0, %v69_v58 }
  0xe2   :  { %642 = vmatmul.mubr.msk.bf16.vlgmr.msra.gmra.mrb[0].mxu0 %vm59_vm0, %v69_v58  ;;  %660 = vmatmul.mubr.msk.bf16.vlgmr.msra.gmra.mrb[0].mxu1 %vm59_vm0, %v69_v58  ;;  %vm562_vm0 = vcmp.eq.s32.totalorder %v946_v20, %v942_v18 }
 0x1b5   :  { %v926_v59 = vpop.f32.mrb[0].mxu0  ;;  %v928_v60 = vpop.f32.mrb[0].mxu1 }
 0x1b6   :  { %v476_v61 = vmul.f32 %v926_v59, %v926_v59  ;;  %v932_v62 = vpop.f32.mrb[1].mxu0  ;;  %v478_v63 = vmul.f32 %v928_v60, %v928_v60  ;;  %v936_v0 = vpop.f32.mrb[1].mxu1  ;;  %v516_v22 = vmul.f32 26.327477, %v926_v59  ;;  %v528_v23 = vmul.f32 30.0, %v926_v59 }
 0x1b7   :  { %v477_v2 = vmul.f32 %v932_v62, %v932_v62  ;;  %v432_v3 = vpop.f32.mrb[2].mxu0  ;;  %v479_v7 = vmul.f32 %v936_v0, %v936_v0  ;;  %v473_v8 = vpop.f32.mrb[2].mxu1  ;;  %vm532_vm4 = vcmp.gt.f32.partialorder %v926_v59, -0.87758255  ;;  %v518_v26 = vmul.f32 26.327477, %v928_v60 }
 0x1b8   :  { %v480_v1 = vsub.f32 1.0, %v476_v61  ;;  %v482_v4 = vsub.f32 1.0, %v478_v63  ;;  %v433_v9 = vpop.f32.mrb[3].mxu0  ;;  %v474_v12 = vpop.f32.mrb[3].mxu1  ;;  %v530_v27 = vmul.f32 30.0, %v928_v60  ;;  %v529_v46 = vmul.f32 30.0, %v932_v62 }
 0x1b9   :  { %v481_v6 = vsub.f32 1.0, %v477_v2  ;;  %v483_v14 = vsub.f32 1.0, %v479_v7  ;;  %vm534_vm6 = vcmp.gt.f32.partialorder %v928_v60, -0.87758255  ;;  %v621_v34 = vadd.f32 -7.191383, %v528_v23 }
 0x1ba   :  { %v484_v5 = vmax.f32 %v480_v1, 0.0  ;;  %v486_v11 = vmax.f32 %v482_v4, 0.0  ;;  %v517_v39 = vmul.f32 26.327477, %v932_v62  ;;  %v623_v41 = vadd.f32 -7.191383, %v530_v27 }
 0x1bb   :  { %v485_v13 = vmax.f32 %v481_v6, 0.0  ;;  %v487_v16 = vmax.f32 %v483_v14, 0.0  ;;  %v531_v50 = vmul.f32 30.0, %v936_v0  ;;  %v622_v58 = vadd.f32 -7.191383, %v529_v46 }
 0x1bc   :  { %719 = vrsqrt.f32 %v484_v5  ;;  %vm490_vm5 = vcmp.eq.f32.partialorder %v484_v5, inf  ;;  %v493_v28 = vand.u32 2147483648, %v484_v5  ;;  %vm492_vm7 = vcmp.eq.f32.partialorder %v484_v5, 0.0 }
 0x1bd   :  { %721 = vrsqrt.f32 %v486_v11  ;;  %vm504_vm8 = vcmp.eq.f32.partialorder %v486_v11, inf  ;;  %v507_v31 = vand.u32 2147483648, %v486_v11  ;;  %vm506_vm10 = vcmp.eq.f32.partialorder %v486_v11, 0.0 }
 0x1be   :  { %723 = vrsqrt.f32 %v485_v13  ;;  %vm497_vm11 = vcmp.eq.f32.partialorder %v485_v13, inf  ;;  %v500_v42 = vand.u32 2147483648, %v485_v13  ;;  %vm499_vm12 = vcmp.eq.f32.partialorder %v485_v13, 0.0 }
 0x1bf   :  { %725 = vrsqrt.f32 %v487_v16  ;;  %vm511_vm13 = vcmp.eq.f32.partialorder %v487_v16, inf  ;;  %v514_v52 = vand.u32 2147483648, %v487_v16  ;;  %vm513_vm14 = vcmp.eq.f32.partialorder %v487_v16, 0.0 }
 0x1c0   :  { %vm533_vm15 = vcmp.gt.f32.partialorder %v932_v62, -0.87758255  ;;  %v519_v59 = vmul.f32 26.327477, %v936_v0  ;;  %v624_v3 = vadd.f32 -7.191383, %v531_v50 }
 0x1c1   :  { %vm535_vm1 = vcmp.gt.f32.partialorder %v936_v0, -0.87758255 }
 0x1c6   :  { %v720_v21 = vpop.eup %719 }
 0x1c7   :  { %v722_v24 = vpop.eup %721  ;;  %v489_v25 = vmul.f32 %v720_v21, %v484_v5 }
 0x1c8   :  { %v503_v29 = vmul.f32 %v722_v24, %v486_v11  ;;  %v724_v32 = vpop.eup %723 }
 0x1c9   :  { %v491_v30 = vsel %vm490_vm5, %v484_v5, %v489_v25  ;;  %v496_v38 = vmul.f32 %v724_v32, %v485_v13  ;;  %v726_v43 = vpop.eup %725 }
 0x1ca   :  { %v494_v33 = vsel %vm492_vm7, %v493_v28, %v491_v30  ;;  %v505_v35 = vsel %vm504_vm8, %v486_v11, %v503_v29  ;;  %v510_v49 = vmul.f32 %v726_v43, %v487_v16 }
 0x1cb   :  { %v520_v36 = vmul.f32 14.382766, %v494_v33  ;;  %v508_v37 = vsel %vm506_vm10, %v507_v31, %v505_v35  ;;  %v498_v45 = vsel %vm497_vm11, %v485_v13, %v496_v38 }
 0x1cc   :  { %v522_v40 = vmul.f32 14.382766, %v508_v37  ;;  %v501_v48 = vsel %vm499_vm12, %v500_v42, %v498_v45  ;;  %v512_v54 = vsel %vm511_vm13, %v487_v16, %v510_v49 }
 0x1cd   :  { %v524_v44 = vsub.f32 %v516_v22, %v520_v36  ;;  %v521_v51 = vmul.f32 14.382766, %v501_v48  ;;  %v515_v61 = vsel %vm513_vm14, %v514_v52, %v512_v54 }
 0x1ce   :  { %v526_v47 = vsub.f32 %v518_v26, %v522_v40  ;;  %v523_v1 = vmul.f32 14.382766, %v515_v61 }
 0x1cf   :  { %v540_v53 = vsel %vm532_vm4, %v524_v44, %v621_v34  ;;  %v525_v57 = vsub.f32 %v517_v39, %v521_v51 }
 0x1d0   :  { %v542_v55 = vsel %vm534_vm6, %v526_v47, %v623_v41  ;;  %v563_v56 = vsel %vm559_vm2, %v540_v53, %v528_v23  ;;  %v527_v60 = vsub.f32 %v519_v59, %v523_v1 }
 0x1d1   :  { %v565_v63 = vsel %vm561_vm3, %v542_v55, %v530_v27  ;;  %567 = vst [vmem:[#allocation9] sm:$0xff] %v563_v56  ;;  %v541_v2 = vsel %vm533_vm15, %v525_v57, %v622_v58 }
 0x1d2   :  { %569 = vst [vmem:[#allocation9 + $0x10] sm:$0xff] %v565_v63  ;;  %v564_v4 = vsel %vm560_vm9, %v541_v2, %v529_v46  ;;  %v543_v62 = vsel %vm535_vm1, %v527_v60, %v624_v3 }
 0x1d3   :  { %568 = vst [vmem:[#allocation9 + $0x8] sm:$0xff] %v564_v4  ;;  %v566_v5 = vsel %vm562_vm0, %v543_v62, %v531_v50 }
 0x1d4   :  { %570 = vst [vmem:[#allocation9 + $0x18] sm:$0xff] %v566_v5 }
 0x1d5   :  { %804 = shalt.err (!%p801_p0)
}
 0x1d6   :  { %s805_s25 = scalar_lea.hbm %s992_s3, 512 }
 0x1d7   :  { %p806_p1 = scmp.ne.s32.totalorder %s992_s3, %s805_s25  ;;  %p809_p2 = scmp.lt.u32.totalorder %s805_s25, %s992_s3 }
 0x1d9   :  { %p811_p3 = pnand %p809_p2, %p806_p1 }
 0x1db   :  { %814 = shalt.err (!%p811_p3)
}
 0x1dc   :  { %580 = dma.vmem_to_hbm [thread:$0]  %s578_s21, 512, %s992_s3, [#allocation5]  }
 0x1dd   :  { %819 = dma.done.wait [#allocation5], 512  }
 0x1de   :  { %820 = vsyncadd [#allocation5], 4294966784 }
 0x1df   :  { %584 = vsyncpa [#allocation4], 1 }
 0x1e0   :  { %585 = vsyncpa [#allocation7], 1 }
 0x1e1   :  { %586 = vsyncpa [#allocation5], 1 }

</bundles_post_ra>
